<compile_context>
chip_gen: v7x
topology: tpu7x:2x2x1
jax: 0.10.0
libtpu: 0.0.40
codegen_flags: <defaults>
</compile_context>

<pallas_src>
import jax
import jax.numpy as jnp
from jax.experimental import pallas as pl
from jax.experimental.pallas import tpu as pltpu


def _round_up(x, m):
    return ((x + m - 1) // m) * m


def _make_kernel(B, bt, need_mask):
    """Builds the kernel body; B, bt, need_mask are trace-time constants."""

    def kernel(margins_ref, a_ref, p_ref, n_ref,
               pos_ref, neg_ref, pos_acc_ref, sq_acc_ref):
        i = pl.program_id(0)          # batch tile    (parallel)
        j = pl.program_id(1)          # feature tile  (arbitrary / reduction)

        @pl.when(j == 0)
        def _init():
            pos_ref[...] = jnp.zeros_like(pos_ref)
            neg_ref[...] = jnp.zeros_like(neg_ref)
            pos_acc_ref[...] = jnp.zeros_like(pos_acc_ref)
            sq_acc_ref[...] = jnp.zeros_like(sq_acc_ref)

        a = a_ref[...].astype(jnp.float32)          # [bt, dt]
        p = p_ref[...].astype(jnp.float32)          # [bt, dt]
        n = n_ref[...].astype(jnp.float32)          # [bt, dt]

        dpos = a - p
        dneg = a - n
        sq_pos = dpos * dpos
        sq_neg = dneg * dneg

        if need_mask:
            # Ragged trailing batch tile: zero out rows >= B (select, so any
            # garbage/NaN in the over-hang region cannot propagate).
            rows = i * bt + jax.lax.broadcasted_iota(jnp.int32, a.shape, 0)
            row_mask = rows < B
            sq_pos = jnp.where(row_mask, sq_pos, 0.0)
            sq_neg = jnp.where(row_mask, sq_neg, 0.0)

        # Per-row (lane) reduces only; sublane reduce deferred to finalize.
        pos_acc_ref[...] = pos_acc_ref[...] + jnp.sum(sq_pos, axis=1,
                                                      keepdims=True)
        sq_acc_ref[...] = sq_acc_ref[...] + jnp.sum(sq_neg, axis=1,
                                                    keepdims=True)

        @pl.when(j == pl.num_programs(1) - 1)
        def _finalize():
            dist = jnp.sqrt(sq_acc_ref[...])                    # [bt, 1]
            resid = margins_ref[...].astype(jnp.float32) - dist  # [bt, 1]
            if need_mask:
                rows_c = i * bt + jax.lax.broadcasted_iota(
                    jnp.int32, resid.shape, 0)
                resid = jnp.where(rows_c < B, resid, 0.0)
            s_pos = jnp.sum(pos_acc_ref[...])
            s_neg = jnp.sum(resid * resid)
            pos_ref[...] = jnp.zeros_like(pos_ref) + s_pos
            neg_ref[...] = jnp.zeros_like(neg_ref) + s_neg

    return kernel


def _choose_tiles(B, D, itemsize):
    """Pick (batch_tile, feature_tile) that keep the DMA pipeline in VMEM."""
    # Feature (lane) tile: full D, or the largest divisor of D that is a
    # multiple of 128, capped at 2048 lanes.
    if D % 128 == 0 and D > 2048:
        dt = next((t for t in (2048, 1024, 512, 384, 256, 128) if D % t == 0),
                  D)
    else:
        dt = D
    # Sublane rounding: packed sub-32-bit dtypes want 16/32-row multiples.
    sub = max(8, 32 // max(1, itemsize))
    # Per-step input budget: 3 inputs x 2 pipeline buffers x bt x dt x itemsize
    # kept under ~24 MiB — fits comfortably inside the 48 MiB scoped limit on
    # v7x (64 MiB physical) and the 64 MiB limit on v5e/v6e (128 MiB).
    budget = 24 * 1024 * 1024
    max_rows = max(sub, budget // (3 * 2 * dt * itemsize))
    if B <= max_rows:
        if B >= 256:
            # Megacore: split into two batch tiles so the 'parallel' axis can
            # feed both v7x TensorCores (no effect on v5e/v6e correctness).
            bt = _round_up((B + 1) // 2, sub)
        else:
            bt = B          # single full-extent batch tile (no masking)
    else:
        bt = max(sub, min(2048, (max_rows // sub) * sub))
    return bt, dt


def _vmem_limit_bytes():
    """Generation-aware scoped VMEM limit (<=48 MiB on v7x, 64 MiB on v5e/v6e)."""
    phys = 64 * 1024 * 1024           # conservative default (v7x per-TC VMEM)
    try:
        phys = int(pltpu.get_tpu_info().vmem_capacity_bytes)
    except Exception:
        pass
    return min(phys * 3 // 4, 64 * 1024 * 1024)


def distance_loss_multiple_margins(anchor_output, positive_output,
                                   negative_output, anchor_label,
                                   negative_label, margin_matrix):
    """JAX/Pallas equivalent of DistanceLossMultipleMargins.forward (scalar)."""
    B, D = anchor_output.shape
    itemsize = jnp.dtype(anchor_output.dtype).itemsize

    # Glue: gather per-sample margins (pure indexing, no compute).
    # TODO(synk): could be folded into the kernel with scalar-prefetched label
    # arrays, but it is a tiny gather next to the 3*B*D input stream.
    margins = margin_matrix[anchor_label, negative_label]
    margins = margins.reshape(B, 1).astype(jnp.float32)

    bt, dt = _choose_tiles(B, D, itemsize)
    nbt = pl.cdiv(B, bt)
    ndt = pl.cdiv(D, dt)
    need_mask = (B % bt) != 0

    kernel = _make_kernel(B, bt, need_mask)

    cost = pl.CostEstimate(
        flops=8 * B * D + 8 * B,
        transcendentals=B,
        bytes_accessed=3 * B * D * itemsize + B * 4 + 2 * nbt * 128 * 4,
    )

    pos_part, neg_part = pl.pallas_call(
        kernel,
        out_shape=(jax.ShapeDtypeStruct((nbt, 1, 128), jnp.float32),
                   jax.ShapeDtypeStruct((nbt, 1, 128), jnp.float32)),
        grid=(nbt, ndt),
        in_specs=[
            pl.BlockSpec((bt, 1), lambda i, j: (i, 0)),     # margins  [B, 1]
            pl.BlockSpec((bt, dt), lambda i, j: (i, j)),    # anchor   [B, D]
            pl.BlockSpec((bt, dt), lambda i, j: (i, j)),    # positive [B, D]
            pl.BlockSpec((bt, dt), lambda i, j: (i, j)),    # negative [B, D]
        ],
        out_specs=(pl.BlockSpec((1, 1, 128), lambda i, j: (i, 0, 0)),
                   pl.BlockSpec((1, 1, 128), lambda i, j: (i, 0, 0))),
        scratch_shapes=[pltpu.VMEM((bt, 1), jnp.float32),   # pos_acc
                        pltpu.VMEM((bt, 1), jnp.float32)],  # sq_acc
        compiler_params=pltpu.CompilerParams(
            dimension_semantics=("parallel", "arbitrary"),
            vmem_limit_bytes=_vmem_limit_bytes()),
        cost_estimate=cost,
    )(margins, anchor_output, positive_output, negative_output)

    # Final tiny reduction + exact scaling (applied exactly once, in f32).
    loss_pos = jnp.sum(pos_part[:, 0, 0]) / float(B * D)
    loss_neg = jnp.sum(neg_part[:, 0, 0]) / float(B)
    return loss_pos + loss_neg


def _reference(anchor, positive, negative, a_lab, n_lab, margin_matrix):
    loss_pos = jnp.mean((anchor - positive) ** 2)
    dist = jnp.linalg.norm(anchor - negative, axis=1)
    margins = margin_matrix[a_lab, n_lab]
    loss_neg = jnp.mean((margins - dist) ** 2)
    return loss_pos + loss_neg


if __name__ == "__main__":
    B, D, NUM_CLASSES = 8, 32, 4

    key = jax.random.PRNGKey(0)
    k_a, k_p, k_n, k_al, k_nl = jax.random.split(key, 5)

    anchor = jax.random.normal(k_a, (B, D), dtype=jnp.float32)
    positive = jax.random.normal(k_p, (B, D), dtype=jnp.float32)
    negative = jax.random.normal(k_n, (B, D), dtype=jnp.float32)
    anchor_label = jax.random.randint(k_al, (B,), 0, NUM_CLASSES, dtype=jnp.int32)
    negative_label = jax.random.randint(k_nl, (B,), 0, NUM_CLASSES, dtype=jnp.int32)

    # Deterministic margin matrix: margin grows with class distance.
    cls = jnp.arange(NUM_CLASSES, dtype=jnp.float32)
    margin_matrix = 1.0 + jnp.abs(cls[:, None] - cls[None, :])   # [C, C]

    loss = jax.jit(distance_loss_multiple_margins)(
        anchor, positive, negative, anchor_label, negative_label, margin_matrix)
    loss = jax.block_until_ready(loss)

    ref = _reference(anchor, positive, negative, anchor_label,
                     negative_label, margin_matrix)
    assert jnp.allclose(loss, ref, rtol=1e-5, atol=1e-5), (loss, ref)

    print("KERNEL_OK")
</pallas_src>

<mosaic_0001>
module attributes {stable_mosaic.version = 11 : i64} {
  func.func @kernel(%arg0: i32, %arg1: i32, %arg2: memref<8x1xf32, #tpu.memory_space<vmem>>, %arg3: memref<8x32xf32, #tpu.memory_space<vmem>>, %arg4: memref<8x32xf32, #tpu.memory_space<vmem>>, %arg5: memref<8x32xf32, #tpu.memory_space<vmem>>, %arg6: memref<1x1x128xf32, #tpu.memory_space<vmem>>, %arg7: memref<1x1x128xf32, #tpu.memory_space<vmem>>, %arg8: memref<8x1xf32, #tpu.memory_space<vmem>>, %arg9: memref<8x1xf32, #tpu.memory_space<vmem>>) attributes {dimension_semantics = [#tpu.dimension_semantics<parallel>, #tpu.dimension_semantics<arbitrary>], iteration_bounds = array<i64: 1, 1>, scalar_prefetch = 0 : i64, scratch_operands = 2 : i64, tpu.core_type = #tpu.core_type<tc>, window_params = [{transform_indices = @transform_0, window_bounds = array<i64: 8, 1>}, {transform_indices = @transform_1, window_bounds = array<i64: 8, 32>}, {transform_indices = @transform_2, window_bounds = array<i64: 8, 32>}, {transform_indices = @transform_3, window_bounds = array<i64: 8, 32>}, {transform_indices = @transform_4, window_bounds = array<i64: 1, 1, 128>}, {transform_indices = @transform_5, window_bounds = array<i64: 1, 1, 128>}]} {
    %c0_i32 = arith.constant 0 : i32
    %0 = arith.cmpi eq, %arg1, %c0_i32 : i32
    %1 = arith.extui %0 : i1 to i32
    %c0_i32_0 = arith.constant 0 : i32
    %2 = arith.cmpi ne, %1, %c0_i32_0 : i32
    scf.if %2 {
      %cst_17 = arith.constant 0.000000e+00 : f32
      %23 = vector.broadcast %cst_17 : f32 to vector<1x1x128xf32>
      %c0_18 = arith.constant 0 : index
      %c0_19 = arith.constant 0 : index
      %c0_20 = arith.constant 0 : index
      %24 = vector.load %arg6[%c0_18, %c0_19, %c0_20] : memref<1x1x128xf32, #tpu.memory_space<vmem>>, vector<1x1x128xf32>
      tpu.vector_store %arg6[%c0_18, %c0_19, %c0_20], %23 {strides = array<i32>} : memref<1x1x128xf32, #tpu.memory_space<vmem>>, vector<1x1x128xf32>,
      %cst_21 = arith.constant 0.000000e+00 : f32
      %25 = vector.broadcast %cst_21 : f32 to vector<1x1x128xf32>
      %c0_22 = arith.constant 0 : index
      %c0_23 = arith.constant 0 : index
      %c0_24 = arith.constant 0 : index
      %26 = vector.load %arg7[%c0_22, %c0_23, %c0_24] : memref<1x1x128xf32, #tpu.memory_space<vmem>>, vector<1x1x128xf32>
      tpu.vector_store %arg7[%c0_22, %c0_23, %c0_24], %25 {strides = array<i32>} : memref<1x1x128xf32, #tpu.memory_space<vmem>>, vector<1x1x128xf32>,
      %cst_25 = arith.constant 0.000000e+00 : f32
      %27 = vector.broadcast %cst_25 : f32 to vector<8x1xf32>
      %c0_26 = arith.constant 0 : index
      %c0_27 = arith.constant 0 : index
      %28 = vector.load %arg8[%c0_26, %c0_27] : memref<8x1xf32, #tpu.memory_space<vmem>>, vector<8x1xf32>
      tpu.vector_store %arg8[%c0_26, %c0_27], %27 {strides = array<i32>} : memref<8x1xf32, #tpu.memory_space<vmem>>, vector<8x1xf32>,
      %cst_28 = arith.constant 0.000000e+00 : f32
      %29 = vector.broadcast %cst_28 : f32 to vector<8x1xf32>
      %c0_29 = arith.constant 0 : index
      %c0_30 = arith.constant 0 : index
      %30 = vector.load %arg9[%c0_29, %c0_30] : memref<8x1xf32, #tpu.memory_space<vmem>>, vector<8x1xf32>
      tpu.vector_store %arg9[%c0_29, %c0_30], %29 {strides = array<i32>} : memref<8x1xf32, #tpu.memory_space<vmem>>, vector<8x1xf32>,
    } else {
    }
    %c0 = arith.constant 0 : index
    %c0_1 = arith.constant 0 : index
    %3 = vector.load %arg3[%c0, %c0_1] : memref<8x32xf32, #tpu.memory_space<vmem>>, vector<8x32xf32>
    %c0_2 = arith.constant 0 : index
    %c0_3 = arith.constant 0 : index
    %4 = vector.load %arg4[%c0_2, %c0_3] : memref<8x32xf32, #tpu.memory_space<vmem>>, vector<8x32xf32>
    %c0_4 = arith.constant 0 : index
    %c0_5 = arith.constant 0 : index
    %5 = vector.load %arg5[%c0_4, %c0_5] : memref<8x32xf32, #tpu.memory_space<vmem>>, vector<8x32xf32>
    %6 = arith.subf %3, %4 : vector<8x32xf32>
    %7 = arith.subf %3, %5 : vector<8x32xf32>
    %8 = arith.mulf %6, %6 : vector<8x32xf32>
    %9 = arith.mulf %7, %7 : vector<8x32xf32>
    %c0_6 = arith.constant 0 : index
    %c0_7 = arith.constant 0 : index
    %10 = vector.load %arg8[%c0_6, %c0_7] : memref<8x1xf32, #tpu.memory_space<vmem>>, vector<8x1xf32>
    %cst = arith.constant dense<0.000000e+00> : vector<8xf32>
    %11 = vector.multi_reduction <add>, %8, %cst [1] : vector<8x32xf32> to vector<8xf32>
    %12 = vector.shape_cast %11 : vector<8xf32> to vector<8x1xf32>
    %13 = arith.addf %10, %12 : vector<8x1xf32>
    %c0_8 = arith.constant 0 : index
    %c0_9 = arith.constant 0 : index
    %14 = vector.load %arg8[%c0_8, %c0_9] : memref<8x1xf32, #tpu.memory_space<vmem>>, vector<8x1xf32>
    tpu.vector_store %arg8[%c0_8, %c0_9], %13 {strides = array<i32>} : memref<8x1xf32, #tpu.memory_space<vmem>>, vector<8x1xf32>,
    %c0_10 = arith.constant 0 : index
    %c0_11 = arith.constant 0 : index
    %15 = vector.load %arg9[%c0_10, %c0_11] : memref<8x1xf32, #tpu.memory_space<vmem>>, vector<8x1xf32>
    %cst_12 = arith.constant dense<0.000000e+00> : vector<8xf32>
    %16 = vector.multi_reduction <add>, %9, %cst_12 [1] : vector<8x32xf32> to vector<8xf32>
    %17 = vector.shape_cast %16 : vector<8xf32> to vector<8x1xf32>
    %18 = arith.addf %15, %17 : vector<8x1xf32>
    %c0_13 = arith.constant 0 : index
    %c0_14 = arith.constant 0 : index
    %19 = vector.load %arg9[%c0_13, %c0_14] : memref<8x1xf32, #tpu.memory_space<vmem>>, vector<8x1xf32>
    tpu.vector_store %arg9[%c0_13, %c0_14], %18 {strides = array<i32>} : memref<8x1xf32, #tpu.memory_space<vmem>>, vector<8x1xf32>,
    %c0_i32_15 = arith.constant 0 : i32
    %20 = arith.cmpi eq, %arg1, %c0_i32_15 : i32
    %21 = arith.extui %20 : i1 to i32
    %c0_i32_16 = arith.constant 0 : i32
    %22 = arith.cmpi ne, %21, %c0_i32_16 : i32
    scf.if %22 {
      %c0_17 = arith.constant 0 : index
      %c0_18 = arith.constant 0 : index
      %23 = vector.load %arg9[%c0_17, %c0_18] : memref<8x1xf32, #tpu.memory_space<vmem>>, vector<8x1xf32>
      %24 = math.sqrt %23 : vector<8x1xf32>
      %c0_19 = arith.constant 0 : index
      %c0_20 = arith.constant 0 : index
      %25 = vector.load %arg2[%c0_19, %c0_20] : memref<8x1xf32, #tpu.memory_space<vmem>>, vector<8x1xf32>
      %26 = arith.subf %25, %24 : vector<8x1xf32>
      %c0_21 = arith.constant 0 : index
      %c0_22 = arith.constant 0 : index
      %27 = vector.load %arg8[%c0_21, %c0_22] : memref<8x1xf32, #tpu.memory_space<vmem>>, vector<8x1xf32>
      %28 = vector.shape_cast %27 : vector<8x1xf32> to vector<1x8x1xf32>
      %cst_23 = arith.constant dense<0.000000e+00> : vector<1xf32>
      %29 = vector.multi_reduction <add>, %28, %cst_23 [1, 2] : vector<1x8x1xf32> to vector<1xf32>
      %30 = vector.shape_cast %29 : vector<1xf32> to vector<1x1x1xf32>
      %31 = vector.extract %30[0, 0, 0] : f32 from vector<1x1x1xf32>
      %32 = arith.mulf %26, %26 : vector<8x1xf32>
      %33 = vector.shape_cast %32 : vector<8x1xf32> to vector<1x8x1xf32>
      %cst_24 = arith.constant dense<0.000000e+00> : vector<1xf32>
      %34 = vector.multi_reduction <add>, %33, %cst_24 [1, 2] : vector<1x8x1xf32> to vector<1xf32>
      %35 = vector.shape_cast %34 : vector<1xf32> to vector<1x1x1xf32>
      %36 = vector.extract %35[0, 0, 0] : f32 from vector<1x1x1xf32>
      %cst_25 = arith.constant 0.000000e+00 : f32
      %37 = vector.broadcast %cst_25 : f32 to vector<1x1x128xf32>
      %38 = vector.broadcast %31 : f32 to vector<1x1x128xf32>
      %39 = arith.addf %37, %38 : vector<1x1x128xf32>
      %c0_26 = arith.constant 0 : index
      %c0_27 = arith.constant 0 : index
      %c0_28 = arith.constant 0 : index
      %40 = vector.load %arg6[%c0_26, %c0_27, %c0_28] : memref<1x1x128xf32, #tpu.memory_space<vmem>>, vector<1x1x128xf32>
      tpu.vector_store %arg6[%c0_26, %c0_27, %c0_28], %39 {strides = array<i32>} : memref<1x1x128xf32, #tpu.memory_space<vmem>>, vector<1x1x128xf32>,
      %cst_29 = arith.constant 0.000000e+00 : f32
      %41 = vector.broadcast %cst_29 : f32 to vector<1x1x128xf32>
      %42 = vector.broadcast %36 : f32 to vector<1x1x128xf32>
      %43 = arith.addf %41, %42 : vector<1x1x128xf32>
      %c0_30 = arith.constant 0 : index
      %c0_31 = arith.constant 0 : index
      %c0_32 = arith.constant 0 : index
      %44 = vector.load %arg7[%c0_30, %c0_31, %c0_32] : memref<1x1x128xf32, #tpu.memory_space<vmem>>, vector<1x1x128xf32>
      tpu.vector_store %arg7[%c0_30, %c0_31, %c0_32], %43 {strides = array<i32>} : memref<1x1x128xf32, #tpu.memory_space<vmem>>, vector<1x1x128xf32>,
    } else {
    }
    return
  }
  func.func @transform_0(%arg0: i32, %arg1: i32) -> (i32, i32) {
    %c0_i32 = arith.constant 0 : i32
    %c0_i32_0 = arith.constant 0 : i32
    return %arg0, %c0_i32 : i32, i32
  }
  func.func @transform_1(%arg0: i32, %arg1: i32) -> (i32, i32) {
    %c0_i32 = arith.constant 0 : i32
    return %arg0, %arg1 : i32, i32
  }
  func.func @transform_2(%arg0: i32, %arg1: i32) -> (i32, i32) {
    %c0_i32 = arith.constant 0 : i32
    return %arg0, %arg1 : i32, i32
  }
  func.func @transform_3(%arg0: i32, %arg1: i32) -> (i32, i32) {
    %c0_i32 = arith.constant 0 : i32
    return %arg0, %arg1 : i32, i32
  }
  func.func @transform_4(%arg0: i32, %arg1: i32) -> (i32, i32, i32) {
    %c0_i32 = arith.constant 0 : i32
    %c0_i32_0 = arith.constant 0 : i32
    %c0_i32_1 = arith.constant 0 : i32
    return %arg0, %c0_i32, %c0_i32_0 : i32, i32, i32
  }
  func.func @transform_5(%arg0: i32, %arg1: i32) -> (i32, i32, i32) {
    %c0_i32 = arith.constant 0 : i32
    %c0_i32_0 = arith.constant 0 : i32
    %c0_i32_1 = arith.constant 0 : i32
    return %arg0, %c0_i32, %c0_i32_0 : i32, i32, i32
  }
}

</mosaic_0001>

<bundles_post_ra>
// kernel: distance_loss_multiple_margins.1
= control target key start
LH: loop header
LB: loop body
LE: loop exit
PB: predicated region body
PF: predicated region fallthrough
CT: control target
= control target key end

     0   :  { %vm25_vm0 = vcmask 7168   ;;  %v105_v3 = vmov 0.0   ;;  %vm36_vm1 = vcmask 261120   ;;  %s166_s1 = inlined_call_operand.vmem [shape: f32[8,32], index: 1, kind: input, shape index: {}]   ;;  %s167_s3 = inlined_call_operand.vmem [shape: f32[8,32], index: 3, kind: input, shape index: {}]   ;;  %s168_s2 = inlined_call_operand.vmem [shape: f32[8,32], index: 2, kind: input, shape index: {}]   ;;  %s169_s0 = inlined_call_operand.vmem [shape: f32[8,1], index: 0, kind: input, shape index: {}]   ;;  %s170_s4 = inlined_call_operand.vmem [shape: f32[1,1,128], index: 4, kind: output, shape index: {0}]   ;;  %s171_s5 = inlined_call_operand.vmem [shape: f32[1,1,128], index: 5, kind: output, shape index: {1}]  }
   0x1   :  { %v28_v0 = vld [vmem:[%s166_s1] sm:$0xff]  ;;  %27 = vst.msk [vmem:[#allocation3] sm:$0xff] %vm25_vm0, %v105_v3  ;;  %26 = vst.msk [vmem:[#allocation2] sm:$0xff] %vm25_vm0, %v105_v3 }
   0x2   :  { %v30_v1 = vld [vmem:[%s167_s3] sm:$0xff]  ;;  %23 = vst [vmem:[%s170_s4] sm:$0x1] %v105_v3  ;;  %24 = vst [vmem:[%s171_s5] sm:$0x1] %v105_v3 }
   0x3   :  { %v29_v2 = vld [vmem:[%s168_s2] sm:$0xff]  ;;  %v32_v4 = vsub.f32 %v28_v0, %v30_v1 }
   0x4   :  { %v31_v5 = vsub.f32 %v28_v0, %v29_v2  ;;  %v60_v22 = vld [vmem:[%s169_s0] sm:$0xff] }
   0x5   :  { %v34_v6 = vmul.f32 %v32_v4, %v32_v4 }
   0x6   :  { %v33_v7 = vmul.f32 %v31_v5, %v31_v5 }
   0x7   :  { %v44_v8 = vsel %vm36_vm1, %v34_v6, 0.0 }
   0x8   :  { %45 = vadd.xlane.f32.xlu0 %v44_v8  ;;  %v37_v9 = vsel %vm36_vm1, %v33_v7, 0.0  ;;  %v43_v10 = vld [vmem:[#allocation3] sm:$0xff]  ;;  %v35_v13 = vld [vmem:[#allocation2] sm:$0xff] }
   0xc   :  { %38 = vadd.xlane.f32.xlu0 %v37_v9 }
  0x95   :  { %v46_v11 = vpop.xlane.xlu0 %45 }
  0x96   :  { %v47_v12 = vadd.f32 %v46_v11, %v43_v10 }
  0x98   :  { %48 = vst.msk [vmem:[#allocation3] sm:$0xff] %vm25_vm0, %v47_v12 }
  0x99   :  { %v39_v14 = vpop.xlane.xlu0 %38 }
  0x9a   :  { %v40_v15 = vadd.f32 %v39_v14, %v35_v13 }
  0x9c   :  { %42 = vst.msk [vmem:[#allocation2] sm:$0xff] %vm25_vm0, %v40_v15 }
  0x9f   :  { %v52_v16 = vld [vmem:[#allocation3] sm:$0xff] }
  0xa0   :  { %103 = vrsqrt.f32 %v52_v16  ;;  %vm55_vm2 = vcmp.eq.f32.partialorder %v52_v16, inf  ;;  %v58_v21 = vand.u32 2147483648, %v52_v16  ;;  %vm57_vm3 = vcmp.eq.f32.partialorder %v52_v16, 0.0 }
  0xa3   :  { %v62_v17 = vld [vmem:[#allocation2] sm:$0xff] }
  0xa4   :  { %v63_v18 = vsel %vm25_vm0, %v62_v17, 0.0 }
  0xa5   :  { %64 = vadd.xlane.f32.xlu1 %v63_v18 }
  0xaa   :  { %v104_v19 = vpop.eup %103 }
  0xab   :  { %v54_v20 = vmul.f32 %v104_v19, %v52_v16 }
  0xad   :  { %v56_v23 = vsel %vm55_vm2, %v52_v16, %v54_v20 }
  0xae   :  { %v59_v24 = vsel %vm57_vm3, %v58_v21, %v56_v23 }
  0xaf   :  { %v61_v25 = vsub.f32 %v60_v22, %v59_v24 }
  0xb1   :  { %v73_v26 = vmul.f32 %v61_v25, %v61_v25 }
  0xb3   :  { %v74_v27 = vsel %vm25_vm0, %v73_v26, 0.0 }
  0xb4   :  { %75 = vadd.xlane.f32.xlu1 %v74_v27 }
 0x132   :  { %v65_v28 = vpop.xlane.xlu1 %64 }
 0x133   :  { %v66_v29 = vrot.slane %v65_v28, 4 }
 0x135   :  { %v67_v30 = vadd.f32 %v66_v29, %v65_v28 }
 0x137   :  { %v68_v31 = vrot.slane %v67_v30, 2 }
 0x139   :  { %v69_v32 = vadd.f32 %v68_v31, %v67_v30 }
 0x13b   :  { %v70_v33 = vrot.slane %v69_v32, 1 }
 0x13d   :  { %v71_v34 = vadd.f32 %v70_v33, %v69_v32 }
 0x13f   :  { %98 = vpush %v71_v34 }
 0x141   :  { %v76_v35 = vpop.xlane.xlu1 %75 }
 0x142   :  { %v77_v36 = vrot.slane %v76_v35, 4 }
 0x144   :  { %v78_v37 = vadd.f32 %v77_v36, %v76_v35 }
 0x146   :  { %v79_v38 = vrot.slane %v78_v37, 2 }
 0x148   :  { %v80_v39 = vadd.f32 %v79_v38, %v78_v37 }
 0x14a   :  { %v81_v40 = vrot.slane %v80_v39, 1 }
 0x14c   :  { %v82_v41 = vadd.f32 %v81_v40, %v80_v39 }
 0x14e   :  { %100 = vpush %v82_v41 }
 0x170   :  { %s99_s0 = spop %98 }
 0x171   :  { %v84_v42 = vstv %s99_s0 }
 0x172   :  { %86 = vst [vmem:[%s170_s4] sm:$0x1] %v84_v42 }
 0x17f   :  { %s101_s29 = spop %100 }
 0x180   :  { %v87_v43 = vstv %s101_s29 }
 0x181   :  { %89 = vst [vmem:[%s171_s5] sm:$0x1] %v87_v43 }

</bundles_post_ra>
